<compile_context>
chip_gen: v7x
topology: tpu7x:2x2x1
jax: 0.10.0
libtpu: 0.0.40
codegen_flags: <defaults>
</compile_context>

<pallas_src>
import jax
import jax.numpy as jnp
from jax.experimental import pallas as pl
from jax.experimental.pallas import tpu as pltpu


def _round_up(x, m):
    return ((x + m - 1) // m) * m


def classification_net_kernel(x_ref, w1_ref, w2_ref, wfc_ref, b_ref, s_ref,
                              out_ref):
    """One batch tile of ClassificationNet.forward."""
    H = w1_ref.shape[1]
    EMB = w2_ref.shape[1]

    a_emb = s_ref[0]          # embedding-net PReLU slope (SMEM scalar)
    a_cls = s_ref[1]          # ClassificationNet.nonlinear slope (SMEM scalar)

    b = b_ref[...]            # (3, C_PAD) packed biases
    x = x_ref[...]            # (TILE_B, D_in), f32

    # embedding_net: Linear(D_in, H) -> PReLU        (MXU, K = D_in)
    h = jnp.dot(x, w1_ref[...], preferred_element_type=jnp.float32)
    h = h + b[0:1, :H]
    h = jnp.where(h >= 0.0, h, a_emb * h)

    # embedding_net: Linear(H, EMB=2)
    emb = jnp.dot(h, w2_ref[...], preferred_element_type=jnp.float32)
    emb = emb + b[1:2, :EMB]

    # ClassificationNet.nonlinear = nn.PReLU()
    emb = jnp.where(emb >= 0.0, emb, a_cls * emb)

    # fc1: (TILE_B, 2) @ (2, C_PAD) as 2 broadcast FMAs on the VPU
    # (a K=2 contraction is not worth an MXU push/drain).
    wfc = wfc_ref[...]                     # (EMB, C_PAD)
    logits = b[2:3, :]                     # (1, C_PAD); padded lanes are -1e30
    for e in range(EMB):                   # EMB == 2, static unroll
        logits = logits + emb[:, e:e + 1] * wfc[e:e + 1, :]

    # Numerically-stable log_softmax over the lane-dense (padded) class dim.
    m = jnp.max(logits, axis=-1, keepdims=True)
    shifted = logits - m
    lse = jnp.log(jnp.sum(jnp.exp(shifted), axis=-1, keepdims=True))
    out_ref[...] = (shifted - lse).astype(out_ref.dtype)


def classification_net(x, params, *, tile_b=128):
    (w1, b1, a1, w2, b2, a_cls, wfc, bfc) = params
    B, D_in = x.shape
    H = w1.shape[1]
    EMB = w2.shape[1]
    n_classes = wfc.shape[1]

    # ---- wrapper-side packing / padding (layout plumbing, not compute) ----
    # Lane-dense output: pad the class dim to a multiple of 128 lanes.
    C_PAD = _round_up(n_classes, 128)
    NEG = jnp.float32(-1e30)   # padded logits -> exp underflows to exactly 0
    wfc_p = jnp.zeros((EMB, C_PAD), jnp.float32).at[:, :n_classes].set(
        wfc.astype(jnp.float32))

    biases = jnp.zeros((3, C_PAD), jnp.float32)
    biases = biases.at[0, :H].set(b1.reshape(-1))
    biases = biases.at[1, :EMB].set(b2.reshape(-1))
    biases = biases.at[2, :].set(
        jnp.full((C_PAD,), NEG, jnp.float32).at[:n_classes].set(bfc.reshape(-1)))

    slopes = jnp.concatenate(
        [a1.reshape(-1), a_cls.reshape(-1)]).astype(jnp.float32)   # (2,) -> SMEM

    # Batch tiling: multiple-of-8 sublane tile; pad B so the grid divides evenly.
    tile_b = max(8, min(tile_b, _round_up(B, 8)))
    B_pad = _round_up(B, tile_b)
    if B_pad != B:
        x = jnp.pad(x, ((0, B_pad - B), (0, 0)))

    grid = (B_pad // tile_b,)

    out = pl.pallas_call(
        classification_net_kernel,
        out_shape=jax.ShapeDtypeStruct((B_pad, C_PAD), jnp.float32),
        grid=grid,
        in_specs=[
            # batch-tiled activations (double-buffered by the pipeline)
            pl.BlockSpec((tile_b, D_in), lambda i: (i, 0)),
            # weights / packed biases: constant index_map -> VMEM-resident
            pl.BlockSpec((D_in, H), lambda i: (0, 0)),
            pl.BlockSpec((H, EMB), lambda i: (0, 0)),
            pl.BlockSpec((EMB, C_PAD), lambda i: (0, 0)),
            pl.BlockSpec((3, C_PAD), lambda i: (0, 0)),
            # PReLU slopes as SMEM scalars (no padded VMEM tile per scalar)
            pl.BlockSpec(memory_space=pltpu.MemorySpace.SMEM),
        ],
        out_specs=pl.BlockSpec((tile_b, C_PAD), lambda i: (i, 0)),
        compiler_params=pltpu.CompilerParams(
            dimension_semantics=("parallel",)),  # shards tiles over v7x's 2 TCs
    )(x, w1, w2, wfc_p, biases, slopes)

    return out[:B, :n_classes]


def init_params(key, d_in, hidden, emb_dim, n_classes):
    k1, k2, k3, k4, k5, k6 = jax.random.split(key, 6)
    w1 = jax.random.normal(k1, (d_in, hidden), jnp.float32) * 0.1
    b1 = jax.random.normal(k2, (1, hidden), jnp.float32) * 0.1
    a1 = jnp.full((1, 1), 0.25, jnp.float32)        # nn.PReLU() default slope
    w2 = jax.random.normal(k3, (hidden, emb_dim), jnp.float32) * 0.1
    b2 = jax.random.normal(k4, (1, emb_dim), jnp.float32) * 0.1
    a_cls = jnp.full((1, 1), 0.25, jnp.float32)      # nn.PReLU() default slope
    wfc = jax.random.normal(k5, (emb_dim, n_classes), jnp.float32) * 0.1
    bfc = jax.random.normal(k6, (1, n_classes), jnp.float32) * 0.1
    return (w1, b1, a1, w2, b2, a_cls, wfc, bfc)


def reference_forward(x, params):
    (w1, b1, a1, w2, b2, a_cls, wfc, bfc) = params
    h = x @ w1 + b1
    h = jnp.where(h >= 0.0, h, a1 * h)
    emb = h @ w2 + b2
    emb = jnp.where(emb >= 0.0, emb, a_cls * emb)
    logits = emb @ wfc + bfc
    return jax.nn.log_softmax(logits, axis=-1)


if __name__ == "__main__":
    B, D_IN, HIDDEN, EMB_DIM, N_CLASSES = 256, 32, 32, 2, 10

    key = jax.random.PRNGKey(0)
    kx, kp = jax.random.split(key)
    x = jax.random.normal(kx, (B, D_IN), jnp.float32)
    params = init_params(kp, D_IN, HIDDEN, EMB_DIM, N_CLASSES)

    scores = classification_net(x, params, tile_b=128)
    scores = jax.block_until_ready(scores)

    ref = reference_forward(x, params)
    assert scores.shape == (B, N_CLASSES)
    assert jnp.allclose(scores, ref, atol=1e-5, rtol=1e-5), "mismatch vs reference"

    print("KERNEL_OK")
</pallas_src>

<mosaic_0001>
module attributes {stable_mosaic.version = 11 : i64} {
  func.func @classification_net_kernel(%arg0: i32, %arg1: memref<128x32xf32, #tpu.memory_space<vmem>>, %arg2: memref<32x32xf32, #tpu.memory_space<vmem>>, %arg3: memref<32x2xf32, #tpu.memory_space<vmem>>, %arg4: memref<2x128xf32, #tpu.memory_space<vmem>>, %arg5: memref<3x128xf32, #tpu.memory_space<vmem>>, %arg6: memref<2xf32, #tpu.memory_space<smem>>, %arg7: memref<128x128xf32, #tpu.memory_space<vmem>>) attributes {dimension_semantics = [#tpu.dimension_semantics<parallel>], iteration_bounds = array<i64: 2>, scalar_prefetch = 0 : i64, scratch_operands = 0 : i64, tpu.core_type = #tpu.core_type<tc>, window_params = [{transform_indices = @transform_0, window_bounds = array<i64: 128, 32>}, {pipeline_mode = #tpu.pipeline_mode<synchronous>, transform_indices = @transform_1, window_bounds = array<i64: 32, 32>}, {pipeline_mode = #tpu.pipeline_mode<synchronous>, transform_indices = @transform_2, window_bounds = array<i64: 32, 2>}, {pipeline_mode = #tpu.pipeline_mode<synchronous>, transform_indices = @transform_3, window_bounds = array<i64: 2, 128>}, {pipeline_mode = #tpu.pipeline_mode<synchronous>, transform_indices = @transform_4, window_bounds = array<i64: 3, 128>}, {transform_indices = @transform_5, window_bounds = array<i64: 2>}, {transform_indices = @transform_6, window_bounds = array<i64: 128, 128>}]} {
    %c0 = arith.constant 0 : index
    %0 = memref.load %arg6[%c0] : memref<2xf32, #tpu.memory_space<smem>>
    %c1 = arith.constant 1 : index
    %1 = memref.load %arg6[%c1] : memref<2xf32, #tpu.memory_space<smem>>
    %c0_0 = arith.constant 0 : index
    %c0_1 = arith.constant 0 : index
    %2 = vector.load %arg5[%c0_0, %c0_1] : memref<3x128xf32, #tpu.memory_space<vmem>>, vector<3x128xf32>
    %c0_2 = arith.constant 0 : index
    %c0_3 = arith.constant 0 : index
    %3 = vector.load %arg1[%c0_2, %c0_3] : memref<128x32xf32, #tpu.memory_space<vmem>>, vector<128x32xf32>
    %c0_4 = arith.constant 0 : index
    %c0_5 = arith.constant 0 : index
    %4 = vector.load %arg2[%c0_4, %c0_5] : memref<32x32xf32, #tpu.memory_space<vmem>>, vector<32x32xf32>
    %cst = arith.constant dense<0.000000e+00> : vector<128x32xf32>
    %5 = tpu.matmul %3, %4, %cst {dimension_numbers = #tpu.dot_dimension_numbers<[1], [0], [0], [1], [0, 0, 1, 1], [], []>} : vector<128x32xf32>, vector<32x32xf32>, vector<128x32xf32> -> vector<128x32xf32>
    %6 = vector.extract_strided_slice %2 {offsets = [0, 0], sizes = [1, 32], strides = [1, 1]} : vector<3x128xf32> to vector<1x32xf32>
    %7 = vector.broadcast %6 : vector<1x32xf32> to vector<128x32xf32>
    %8 = arith.addf %5, %7 : vector<128x32xf32>
    %cst_6 = arith.constant 0.000000e+00 : f32
    %9 = vector.broadcast %cst_6 : f32 to vector<128x32xf32>
    %10 = arith.cmpf oge, %8, %9 : vector<128x32xf32>
    %11 = vector.broadcast %0 : f32 to vector<128x32xf32>
    %12 = arith.mulf %11, %8 : vector<128x32xf32>
    %13 = arith.select %10, %8, %12 : vector<128x32xi1>, vector<128x32xf32>
    %c0_7 = arith.constant 0 : index
    %c0_8 = arith.constant 0 : index
    %14 = vector.load %arg3[%c0_7, %c0_8] : memref<32x2xf32, #tpu.memory_space<vmem>>, vector<32x2xf32>
    %cst_9 = arith.constant dense<0.000000e+00> : vector<128x2xf32>
    %15 = tpu.matmul %13, %14, %cst_9 {dimension_numbers = #tpu.dot_dimension_numbers<[1], [0], [0], [1], [0, 0, 1, 1], [], []>} : vector<128x32xf32>, vector<32x2xf32>, vector<128x2xf32> -> vector<128x2xf32>
    %16 = vector.extract_strided_slice %2 {offsets = [1, 0], sizes = [1, 2], strides = [1, 1]} : vector<3x128xf32> to vector<1x2xf32>
    %17 = vector.broadcast %16 : vector<1x2xf32> to vector<128x2xf32>
    %18 = arith.addf %15, %17 : vector<128x2xf32>
    %cst_10 = arith.constant 0.000000e+00 : f32
    %19 = vector.broadcast %cst_10 : f32 to vector<128x2xf32>
    %20 = arith.cmpf oge, %18, %19 : vector<128x2xf32>
    %21 = vector.broadcast %1 : f32 to vector<128x2xf32>
    %22 = arith.mulf %21, %18 : vector<128x2xf32>
    %23 = arith.select %20, %18, %22 : vector<128x2xi1>, vector<128x2xf32>
    %c0_11 = arith.constant 0 : index
    %c0_12 = arith.constant 0 : index
    %24 = vector.load %arg4[%c0_11, %c0_12] : memref<2x128xf32, #tpu.memory_space<vmem>>, vector<2x128xf32>
    %25 = vector.extract_strided_slice %2 {offsets = [2, 0], sizes = [1, 128], strides = [1, 1]} : vector<3x128xf32> to vector<1x128xf32>
    %26 = vector.extract_strided_slice %23 {offsets = [0, 0], sizes = [128, 1], strides = [1, 1]} : vector<128x2xf32> to vector<128x1xf32>
    %27 = vector.extract_strided_slice %24 {offsets = [0, 0], sizes = [1, 128], strides = [1, 1]} : vector<2x128xf32> to vector<1x128xf32>
    %28 = vector.broadcast %26 : vector<128x1xf32> to vector<128x128xf32>
    %29 = vector.broadcast %27 : vector<1x128xf32> to vector<128x128xf32>
    %30 = arith.mulf %28, %29 : vector<128x128xf32>
    %31 = vector.broadcast %25 : vector<1x128xf32> to vector<128x128xf32>
    %32 = arith.addf %31, %30 : vector<128x128xf32>
    %33 = vector.extract_strided_slice %23 {offsets = [0, 1], sizes = [128, 1], strides = [1, 1]} : vector<128x2xf32> to vector<128x1xf32>
    %34 = vector.extract_strided_slice %24 {offsets = [1, 0], sizes = [1, 128], strides = [1, 1]} : vector<2x128xf32> to vector<1x128xf32>
    %35 = vector.broadcast %33 : vector<128x1xf32> to vector<128x128xf32>
    %36 = vector.broadcast %34 : vector<1x128xf32> to vector<128x128xf32>
    %37 = arith.mulf %35, %36 : vector<128x128xf32>
    %38 = arith.addf %32, %37 : vector<128x128xf32>
    %cst_13 = arith.constant dense<0xFF800000> : vector<128xf32>
    %39 = vector.multi_reduction <maximumf>, %38, %cst_13 [1] : vector<128x128xf32> to vector<128xf32>
    %40 = vector.shape_cast %39 : vector<128xf32> to vector<128x1xf32>
    %41 = vector.broadcast %40 : vector<128x1xf32> to vector<128x128xf32>
    %42 = arith.subf %38, %41 : vector<128x128xf32>
    %43 = math.exp %42 : vector<128x128xf32>
    %cst_14 = arith.constant dense<0.000000e+00> : vector<128xf32>
    %44 = vector.multi_reduction <add>, %43, %cst_14 [1] : vector<128x128xf32> to vector<128xf32>
    %45 = vector.shape_cast %44 : vector<128xf32> to vector<128x1xf32>
    %46 = math.log %45 : vector<128x1xf32>
    %47 = vector.broadcast %46 : vector<128x1xf32> to vector<128x128xf32>
    %48 = arith.subf %42, %47 : vector<128x128xf32>
    %c0_15 = arith.constant 0 : index
    %c0_16 = arith.constant 0 : index
    %49 = vector.load %arg7[%c0_15, %c0_16] : memref<128x128xf32, #tpu.memory_space<vmem>>, vector<128x128xf32>
    tpu.vector_store %arg7[%c0_15, %c0_16], %48 {strides = array<i32>} : memref<128x128xf32, #tpu.memory_space<vmem>>, vector<128x128xf32>,
    return
  }
  func.func @transform_0(%arg0: i32) -> (i32, i32) {
    %c0_i32 = arith.constant 0 : i32
    %c0_i32_0 = arith.constant 0 : i32
    return %arg0, %c0_i32 : i32, i32
  }
  func.func @transform_1(%arg0: i32) -> (i32, i32) {
    %c0_i32 = arith.constant 0 : i32
    %c0_i32_0 = arith.constant 0 : i32
    %c0_i32_1 = arith.constant 0 : i32
    return %c0_i32, %c0_i32_0 : i32, i32
  }
  func.func @transform_2(%arg0: i32) -> (i32, i32) {
    %c0_i32 = arith.constant 0 : i32
    %c0_i32_0 = arith.constant 0 : i32
    %c0_i32_1 = arith.constant 0 : i32
    return %c0_i32, %c0_i32_0 : i32, i32
  }
  func.func @transform_3(%arg0: i32) -> (i32, i32) {
    %c0_i32 = arith.constant 0 : i32
    %c0_i32_0 = arith.constant 0 : i32
    %c0_i32_1 = arith.constant 0 : i32
    return %c0_i32, %c0_i32_0 : i32, i32
  }
  func.func @transform_4(%arg0: i32) -> (i32, i32) {
    %c0_i32 = arith.constant 0 : i32
    %c0_i32_0 = arith.constant 0 : i32
    %c0_i32_1 = arith.constant 0 : i32
    return %c0_i32, %c0_i32_0 : i32, i32
  }
  func.func @transform_5(%arg0: i32) -> i32 {
    %c0_i32 = arith.constant 0 : i32
    %c0_i32_0 = arith.constant 0 : i32
    return %c0_i32 : i32
  }
  func.func @transform_6(%arg0: i32) -> (i32, i32) {
    %c0_i32 = arith.constant 0 : i32
    %c0_i32_0 = arith.constant 0 : i32
    return %arg0, %c0_i32 : i32, i32
  }
}

</mosaic_0001>

<bundles_post_ra>
// kernel: tpu_custom_call.1
= control target key start
LH: loop header
LB: loop body
LE: loop exit
PB: predicated region body
PF: predicated region fallthrough
CT: control target
= control target key end

     0   :  { %11 = vsyncpa [#allocation4], 0  ;;  %s2234_s0 = inlined_call_operand.vmem [shape: f32[256,32], index: 0, kind: input, shape index: {}]   ;;  %s2235_s1 = inlined_call_operand.vmem [shape: f32[32,32], index: 1, kind: input, shape index: {}]   ;;  %s2236_s2 = inlined_call_operand.vmem [shape: f32[32,2], index: 2, kind: input, shape index: {}]   ;;  %s2237_s3 = inlined_call_operand.vmem [shape: f32[2,128], index: 3, kind: input, shape index: {}]   ;;  %s2238_s4 = inlined_call_operand.vmem [shape: f32[3,128], index: 4, kind: input, shape index: {}]   ;;  %s2239_s5 = inlined_call_operand.vmem [shape: f32[2], index: 5, kind: input, shape index: {}]   ;;  %s2240_s6 = inlined_call_operand.hbm [shape: f32[256,128], index: 6, kind: output, shape index: {}]  }
   0x1   :  { %12 = vsyncpa [#allocation3], 0 }
   0x2   :  { %14 = vsyncpa [#allocation3 + $0x1], 0  ;;  %s1709_s21 = smov 0   ;;  %s1711_s22 = smov 0  }
   0x3   :  { %s1713_s23 = smov 0   ;;  %s1715_s24 = smov 0  }
   0x4 LB: > { %s1730_s25 = sadd.s32 4294967295, %s1666_s24   ;;  %s1272_s26 = sadd.s32 4294967294, %s1666_s24   ;;  %s1666_s24 = sphi %s1715_s24, %s2247_s24   ;;  %s1662_s23 = sphi %s1713_s23, %s2246_s23   ;;  %s1658_s22 = sphi %s1711_s22, %s2245_s22   ;;  %s1654_s21 = sphi %s1709_s21, %s2244_s21  }
   0x5   : > { %s1734_s27 = sadd.s32 1, %s1666_s24   ;;  %s158_s28 = sadd.s32 1, %s1662_s23 }
   0x6   : > { %s155_s29 = ssub.s32 %s1666_s24, %s1734_s27  ;;  %p168_p0 = scmp.ne.s32.totalorder %s1662_s23, %s1658_s22 }
   0x7   : > { %p156_p1 = scmp.eq.s32.totalorder %s155_s29, 0  ;;  %p169_p2 = scmp.eq.s32.totalorder %s1730_s25, 1 }
   0x8   : > { %p174_p3 = scmp.ne.s32.totalorder %s1658_s22, %s1654_s21  ;;  %p175_p4 = scmp.eq.s32.totalorder %s1272_s26, 1 }
   0x9   : > { %s1745_s30 = scalar_select %p156_p1, %s1662_s23, %s158_s28  }
   0xa   : > { %p1747_p5 = por %p169_p2, %p168_p0  ;;  %p1751_p6 = por %p175_p4, %p174_p3 }
   0xb   : > { %p1273_p7 = scmp.ge.s32.totalorder %s1666_s24, 1  ;;  %p182_p8 = scmp.lt.s32.totalorder %s1666_s24, 3 }
   0xc   : > { %p1454_p9 = scmp.eq.s32.totalorder %s1730_s25, 0  ;;  %s207_s12 = sshll.u32 %s2239_s5, 4  ;;  %s208_s12 = int_to_ptr.vmem [resolvable:$true] %s207_s12 }
   0xd   : > { %p1758_p10 = pnand %p1273_p7, %p182_p8  ;;  %s1585_s13 = scalar_lea.vmem %s208_s12, 16 }
   0xe   : > { %p1586_p13 = scmp.ne.s32.totalorder %s208_s12, %s1585_s13  ;;  %p1593_p3 = scmp.lt.s32.totalorder %s208_s12, %s208_s12 }
   0xf   : > { %p1446_p11 = pneg %p1758_p10  ;;  %p1594_p4 = scmp.lt.s32.totalorder %s1585_s13, %s1585_s13 }
  0x11   : > { %p1447_p12 = pnand %p1454_p9, %p1446_p11  ;;  %p1595_p7 = por %p1594_p4, %p1593_p3 }
  0x13   : > { %p1587_p0 = pneg %p1447_p12 }
  0x15   : > { %p1588_p1 = pnand %p1587_p0, %p1586_p13 }
  0x17   : > { %p1589_p2 = pneg %p1588_p1 }
  0x19   : > { %p1596_p8 = pnand %p1595_p7, %p1589_p2 }
  0x1b   : > { %1599 = shalt.err (!%p1596_p8)
}
  0x1c   : > { %s1668_s14 = smov [#allocation2]   ;;  %229 = sbr.rel (%p1758_p10) target bundleno = 1020 (0x3fc), region = 44 }
  0x1d   : > { %1449 = dma.vmem_to_smem (!%p1447_p12), %s208_s12, 16, %s1668_s14, [#allocation4]  }
  0x23   : > { %1645 = dma.done.wait (%p1454_p9), [#allocation4], 16  }
  0x24   : > { %1647 = vsyncadd (%p1454_p9), [#allocation4], 4294967280 }
  0x25   : > { %235 = sfence }
  0x26   : > { %v286_v0 = vld [vmem:[%s2235_s1] sm:$0xff]  ;;  %v287_v1 = vld [vmem:[%s2235_s1 + $0x8] sm:$0xff]  ;;  %v288_v2 = vld [vmem:[%s2235_s1 + $0x10] sm:$0xff]  ;;  %s1279_s26 = sshll.u32 %s1730_s25, 4  ;;  %vm294_vm0 = vcmask 261120   ;;  %v290_v28 = vlaneseq  ;;  %s1319_s15 = sshll.u32 %s1730_s25, 11 }
  0x27   : > { %v1424_v3 = vpack.c.bf16 %v287_v1, %v286_v0  ;;  %v289_v4 = vld [vmem:[%s2235_s1 + $0x18] sm:$0xff]  ;;  %p261_p9 = scmp.lt.s32.totalorder %s1279_s26, 31  ;;  %v537_v22 = vld [vmem:[%s2236_s2] sm:$0xff]  ;;  %v538_v23 = vld [vmem:[%s2236_s2 + $0x8] sm:$0xff]  ;;  %s2185_s19 = scalar_lea.hbm %s2240_s6, %s1319_s15 }
  0x28   : > { %v1428_v5 = vpack.c.bf16 %v289_v4, %v288_v2  ;;  %v1432_v24 = vpack.c.bf16 %v538_v23, %v537_v22  ;;  %v539_v25 = vld [vmem:[%s2236_s2 + $0x10] sm:$0xff]  ;;  %v540_v26 = vld [vmem:[%s2236_s2 + $0x18] sm:$0xff]  ;;  %v1837_v29 = vshrl.u32 %v290_v28, 7  ;;  %v1843_v31 = vld [vmem:[%s2238_s4] sm:$0x7] }
  0x29   : > { %1425 = vmatprep.subr.bf16.mxu0 %v1424_v3  ;;  %s2249_s26 = smov (!%p261_p9, %s1279_s26), 31  ;;  %v1436_v27 = vpack.c.bf16 %v540_v26, %v539_v25 }
  0x2a   : > { %1427 = vmatpush3.bf16.msra.mxu0 %v1424_v3  ;;  %s1280_s9 = sshll.u32 %s2249_s26, 3  ;;  %1433 = vmatprep.subr.bf16.mxu1 %v1432_v24  ;;  %s267_s26 = sld [smem:[#allocation2]]  ;;  %v292_v30 = vsub.s32 0, %v1837_v29 }
  0x2b   : > { %1429 = vmatprep.subr.bf16.mxu0 %v1428_v5  ;;  %s1791_s12 = scalar_lea.vmem %s2234_s0, %s1280_s9  ;;  %1435 = vmatpush3.bf16.msra.mxu1 %v1432_v24  ;;  %s1281_s9 = sld [smem:[#allocation2 + $0x1]] }
  0x2c   : > { %v270_v6 = vld [vmem:[%s1791_s12] sm:$0xff]  ;;  %v271_v7 = vld [vmem:[%s1791_s12 + $0x8] sm:$0xff]  ;;  %v272_v8 = vld [vmem:[%s1791_s12 + $0x10] sm:$0xff]  ;;  %1437 = vmatprep.subr.bf16.mxu1 %v1436_v27  ;;  %v1848_v32 = vrot.slane %v1843_v31, %v292_v30 }
  0x2d   : > { %1368 = vmatprep.mubr.msk.f32.mxu0 %vm294_vm0, %v270_v6  ;;  %v273_v9 = vld [vmem:[%s1791_s12 + $0x18] sm:$0xff]  ;;  %v274_v10 = vld [vmem:[%s1791_s12 + $0x20] sm:$0xff]  ;;  %v275_v11 = vld [vmem:[%s1791_s12 + $0x28] sm:$0xff] }
  0x2e   : > { %1431 = vmatpush3.bf16.msra.mxu0 %v1428_v5  ;;  %v276_v12 = vld [vmem:[%s1791_s12 + $0x30] sm:$0xff]  ;;  %v277_v13 = vld [vmem:[%s1791_s12 + $0x38] sm:$0xff]  ;;  %v278_v14 = vld [vmem:[%s1791_s12 + $0x40] sm:$0xff] }
  0x2f   : > { %v279_v15 = vld [vmem:[%s1791_s12 + $0x48] sm:$0xff]  ;;  %v280_v16 = vld [vmem:[%s1791_s12 + $0x50] sm:$0xff]  ;;  %v281_v17 = vld [vmem:[%s1791_s12 + $0x58] sm:$0xff]  ;;  %1439 = vmatpush3.bf16.msra.mxu1 %v1436_v27 }
  0x30   : > { %v282_v18 = vld [vmem:[%s1791_s12 + $0x60] sm:$0xff]  ;;  %v283_v19 = vld [vmem:[%s1791_s12 + $0x68] sm:$0xff]  ;;  %v284_v20 = vld [vmem:[%s1791_s12 + $0x70] sm:$0xff]  ;;  %v1850_v34 = vstv %s267_s26  ;;  %s1671_s26 = smov [#allocation5]  }
  0x31   : > { %1369 = vmatmul.mubr.msk.f32.vlgmr.msra.gmra.mrb[0].mxu0 %vm294_vm0, %v271_v7  ;;  %v285_v21 = vld [vmem:[%s1791_s12 + $0x78] sm:$0xff]  ;;  %s257_s12 = sand.u32 1, %s1658_s22   ;;  %s1604_s28 = sshll.u32 %s1671_s26, 4  ;;  %s1605_s28 = int_to_ptr.vmem [resolvable:$false] %s1604_s28 }
  0x32   : > { %1371 = vmatprep.mubr.msk.f32.mxu0 %vm294_vm0, %v272_v8  ;;  %s1278_s13 = sshll.u32 %s257_s12, 7  ;;  %s2193_s25 = scalar_lea.sflag [#allocation3], %s257_s12 }
  0x33   : > { %s2149_s14 = scalar_lea.vmem [#allocation5], %s1278_s13  ;;  %s1606_s29 = scalar_lea.vmem %s1605_s28, 4096 }
  0x34   : > { %s1198_s16 = sshll.u32 %s2149_s14, 4  ;;  %s2187_s16 = int_to_ptr.vmem [resolvable:$true] %s1198_s16 }
  0x35   : > { %1372 = vmatmul.mubr.msk.f32.gmra.mrb[2].mxu0 %vm294_vm0, %v273_v9  ;;  %s1600_s20 = scalar_lea.vmem %s2187_s16, 2048  ;;  %p1607_p13 = scmp.lt.s32.totalorder %s2187_s16, %s1605_s28 }
  0x36   : > { %1374 = vmatprep.mubr.msk.f32.mxu0 %vm294_vm0, %v274_v10  ;;  %p1601_p10 = scmp.ne.s32.totalorder %s2187_s16, %s1600_s20  ;;  %p1608_p0 = scmp.lt.s32.totalorder %s1606_s29, %s1600_s20 }
  0x38   : > { %p1602_p11 = pnand %p1601_p10, %p1747_p5  ;;  %p1609_p1 = por %p1608_p0, %p1607_p13 }
  0x39   : > { %1375 = vmatmul.mubr.msk.f32.gmra.mrb[4].mxu0 %vm294_vm0, %v275_v11 }
  0x3a   : > { %1377 = vmatprep.mubr.msk.f32.mxu0 %vm294_vm0, %v276_v12  ;;  %p1603_p12 = pneg %p1602_p11 }
  0x3c   : > { %p1610_p2 = pnand %p1609_p1, %p1603_p12 }
  0x3d   : > { %1378 = vmatmul.mubr.msk.f32.gmra.mrb[6].mxu0 %vm294_vm0, %v277_v13 }
  0x3e   : > { %1380 = vmatprep.mubr.msk.f32.mxu0 %vm294_vm0, %v278_v14 }
  0x41   : > { %1381 = vmatmul.mubr.msk.f32.gmra.mrb[8].mxu0 %vm294_vm0, %v279_v15 }
  0x42   : > { %1383 = vmatprep.mubr.msk.f32.mxu0 %vm294_vm0, %v280_v16 }
  0x45   : > { %1384 = vmatmul.mubr.msk.f32.gmra.mrb[10].mxu0 %vm294_vm0, %v281_v17 }
  0x46   : > { %1386 = vmatprep.mubr.msk.f32.mxu0 %vm294_vm0, %v282_v18 }
  0x49   : > { %1387 = vmatmul.mubr.msk.f32.gmra.mrb[12].mxu0 %vm294_vm0, %v283_v19 }
  0x4a   : > { %1389 = vmatprep.mubr.msk.f32.mxu0 %vm294_vm0, %v284_v20 }
  0x4d   : > { %1390 = vmatmul.mubr.msk.f32.gmra.mrb[14].mxu0 %vm294_vm0, %v285_v21 }
 0x104   : > { %v1370_v33 = vpop.f32.mrb[0].mxu0 }
 0x105   : > { %v415_v35 = vadd.f32 %v1370_v33, %v1848_v32  ;;  %v409_v36 = vpop.f32.mrb[1].mxu0 }
 0x106   : > { %v410_v37 = vadd.f32 %v409_v36, %v1848_v32 }
 0x107   : > { %v506_v38 = vmul.f32 %v1850_v34, %v415_v35  ;;  %vm489_vm1 = vcmp.ge.f32.partialorder %v415_v35, 0.0 }
 0x108   : > { %v1373_v39 = vpop.f32.mrb[2].mxu0  ;;  %vm488_vm2 = vcmp.ge.f32.partialorder %v410_v37, 0.0  ;;  %v505_v40 = vmul.f32 %v1850_v34, %v410_v37 }
 0x109   : > { %v425_v41 = vadd.f32 %v1373_v39, %v1848_v32  ;;  %v419_v42 = vpop.f32.mrb[3].mxu0  ;;  %v522_v46 = vsel %vm489_vm1, %v415_v35, %v506_v38  ;;  %v1669_v39 = vmov 1  }
 0x10a   : > { %v420_v43 = vadd.f32 %v419_v42, %v1848_v32  ;;  %v521_v44 = vsel %vm488_vm2, %v410_v37, %v505_v40  ;;  %1495 = vset.pattern.permute.xlu1 %v1669_v39  ;;  %v543_v40 = vsub.s32 1, %v1837_v29  ;;  %v1908_v42 = vstv %s1281_s9 }
 0x10b   : > { %v508_v45 = vmul.f32 %v1850_v34, %v425_v41  ;;  %1400 = vmatprep.mubr.msk.f32.mxu1 %vm294_vm0, %v521_v44  ;;  %vm491_vm3 = vcmp.ge.f32.partialorder %v425_v41, 0.0 }
 0x10c   : > { %vm490_vm4 = vcmp.ge.f32.partialorder %v420_v43, 0.0  ;;  %v507_v47 = vmul.f32 %v1850_v34, %v420_v43  ;;  %1401 = vmatmul.mubr.msk.f32.vlgmr.msra.gmra.mrb[0].mxu1 %vm294_vm0, %v522_v46  ;;  %v1376_v48 = vpop.f32.mrb[4].mxu0 }
 0x10d   : > { %v435_v49 = vadd.f32 %v1376_v48, %v1848_v32  ;;  %v429_v50 = vpop.f32.mrb[5].mxu0  ;;  %v524_v54 = vsel %vm491_vm3, %v425_v41, %v508_v45  ;;  %v1906_v41 = vrot.slane %v1843_v31, %v543_v40 }
 0x10e   : > { %v523_v51 = vsel %vm490_vm4, %v420_v43, %v507_v47  ;;  %v430_v52 = vadd.f32 %v429_v50, %v1848_v32 }
 0x10f   : > { %1403 = vmatprep.mubr.msk.f32.mxu1 %vm294_vm0, %v523_v51  ;;  %vm493_vm5 = vcmp.ge.f32.partialorder %v435_v49, 0.0  ;;  %v510_v53 = vmul.f32 %v1850_v34, %v435_v49 }
 0x110   : > { %1404 = vmatmul.mubr.msk.f32.gmra.mrb[2].mxu1 %vm294_vm0, %v524_v54  ;;  %vm492_vm6 = vcmp.ge.f32.partialorder %v430_v52, 0.0  ;;  %v509_v55 = vmul.f32 %v1850_v34, %v430_v52  ;;  %v1379_v56 = vpop.f32.mrb[6].mxu0 }
 0x111   : > { %v526_v57 = vsel %vm493_vm5, %v435_v49, %v510_v53  ;;  %v445_v58 = vadd.f32 %v1379_v56, %v1848_v32  ;;  %v439_v59 = vpop.f32.mrb[7].mxu0 }
 0x112   : > { %v525_v60 = vsel %vm492_vm6, %v430_v52, %v509_v55  ;;  %v440_v61 = vadd.f32 %v439_v59, %v1848_v32 }
 0x113   : > { %1406 = vmatprep.mubr.msk.f32.mxu1 %vm294_vm0, %v525_v60  ;;  %vm495_vm7 = vcmp.ge.f32.partialorder %v445_v58, 0.0  ;;  %v512_v62 = vmul.f32 %v1850_v34, %v445_v58 }
 0x114   : > { %1407 = vmatmul.mubr.msk.f32.gmra.mrb[4].mxu1 %vm294_vm0, %v526_v57  ;;  %vm494_vm8 = vcmp.ge.f32.partialorder %v440_v61, 0.0  ;;  %v511_v63 = vmul.f32 %v1850_v34, %v440_v61  ;;  %v1382_v0 = vpop.f32.mrb[8].mxu0 }
 0x115   : > { %v528_v1 = vsel %vm495_vm7, %v445_v58, %v512_v62  ;;  %v455_v2 = vadd.f32 %v1382_v0, %v1848_v32  ;;  %v449_v3 = vpop.f32.mrb[9].mxu0 }
 0x116   : > { %v527_v4 = vsel %vm494_vm8, %v440_v61, %v511_v63  ;;  %v450_v5 = vadd.f32 %v449_v3, %v1848_v32 }
 0x117   : > { %1409 = vmatprep.mubr.msk.f32.mxu1 %vm294_vm0, %v527_v4  ;;  %vm497_vm9 = vcmp.ge.f32.partialorder %v455_v2, 0.0  ;;  %v514_v6 = vmul.f32 %v1850_v34, %v455_v2 }
 0x118   : > { %1410 = vmatmul.mubr.msk.f32.gmra.mrb[6].mxu1 %vm294_vm0, %v528_v1  ;;  %vm496_vm10 = vcmp.ge.f32.partialorder %v450_v5, 0.0  ;;  %v513_v7 = vmul.f32 %v1850_v34, %v450_v5  ;;  %v1385_v8 = vpop.f32.mrb[10].mxu0 }
 0x119   : > { %v530_v9 = vsel %vm497_vm9, %v455_v2, %v514_v6  ;;  %v465_v10 = vadd.f32 %v1385_v8, %v1848_v32  ;;  %v459_v11 = vpop.f32.mrb[11].mxu0 }
 0x11a   : > { %v529_v12 = vsel %vm496_vm10, %v450_v5, %v513_v7  ;;  %v460_v13 = vadd.f32 %v459_v11, %v1848_v32 }
 0x11b   : > { %1412 = vmatprep.mubr.msk.f32.mxu1 %vm294_vm0, %v529_v12  ;;  %vm499_vm11 = vcmp.ge.f32.partialorder %v465_v10, 0.0  ;;  %v516_v14 = vmul.f32 %v1850_v34, %v465_v10 }
 0x11c   : > { %1413 = vmatmul.mubr.msk.f32.gmra.mrb[8].mxu1 %vm294_vm0, %v530_v9  ;;  %vm498_vm12 = vcmp.ge.f32.partialorder %v460_v13, 0.0  ;;  %v515_v15 = vmul.f32 %v1850_v34, %v460_v13  ;;  %v1388_v16 = vpop.f32.mrb[12].mxu0 }
 0x11d   : > { %v532_v17 = vsel %vm499_vm11, %v465_v10, %v516_v14  ;;  %v475_v18 = vadd.f32 %v1388_v16, %v1848_v32  ;;  %v469_v19 = vpop.f32.mrb[13].mxu0 }
 0x11e   : > { %v531_v20 = vsel %vm498_vm12, %v460_v13, %v515_v15  ;;  %v470_v21 = vadd.f32 %v469_v19, %v1848_v32 }
 0x11f   : > { %1415 = vmatprep.mubr.msk.f32.mxu1 %vm294_vm0, %v531_v20  ;;  %vm501_vm13 = vcmp.ge.f32.partialorder %v475_v18, 0.0  ;;  %v518_v22 = vmul.f32 %v1850_v34, %v475_v18 }
 0x120   : > { %1416 = vmatmul.mubr.msk.f32.gmra.mrb[10].mxu1 %vm294_vm0, %v532_v17  ;;  %vm500_vm14 = vcmp.ge.f32.partialorder %v470_v21, 0.0  ;;  %v517_v23 = vmul.f32 %v1850_v34, %v470_v21  ;;  %v1391_v24 = vpop.f32.mrb[14].mxu0 }
 0x121   : > { %v534_v25 = vsel %vm501_vm13, %v475_v18, %v518_v22  ;;  %v485_v26 = vadd.f32 %v1391_v24, %v1848_v32  ;;  %v479_v27 = vpop.f32.mrb[15].mxu0 }
 0x122   : > { %v533_v28 = vsel %vm500_vm14, %v470_v21, %v517_v23  ;;  %v480_v33 = vadd.f32 %v479_v27, %v1848_v32  ;;  %v1670_v32 = vmov 0  }
 0x123   : > { %1418 = vmatprep.mubr.msk.f32.mxu1 %vm294_vm0, %v533_v28  ;;  %vm503_vm15 = vcmp.ge.f32.partialorder %v485_v26, 0.0  ;;  %v520_v35 = vmul.f32 %v1850_v34, %v485_v26  ;;  %1494 = vset.pattern.permute.xlu0 %v1670_v32 }
 0x124   : > { %1419 = vmatmul.mubr.msk.f32.gmra.mrb[12].mxu1 %vm294_vm0, %v534_v25  ;;  %vm502_vm1 = vcmp.ge.f32.partialorder %v480_v33, 0.0  ;;  %v519_v36 = vmul.f32 %v1850_v34, %v480_v33 }
 0x125   : > { %v536_v37 = vsel %vm503_vm15, %v485_v26, %v520_v35 }
 0x126   : > { %v535_v38 = vsel %vm502_vm1, %v480_v33, %v519_v36 }
 0x127   : > { %1421 = vmatprep.mubr.msk.f32.mxu1 %vm294_vm0, %v535_v38 }
 0x128   : > { %1422 = vmatmul.mubr.msk.f32.gmra.mrb[14].mxu1 %vm294_vm0, %v536_v37 }
 0x1df   : > { %v1402_v34 = vpop.f32.mrb[0].mxu1 }
 0x1e0   : > { %v665_v43 = vadd.f32 %v1402_v34, %v1906_v41  ;;  %v659_v44 = vpop.f32.mrb[1].mxu1 }
 0x1e1   : > { %v660_v45 = vadd.f32 %v659_v44, %v1906_v41 }
 0x1e2   : > { %vm739_vm0 = vcmp.ge.f32.partialorder %v665_v43, 0.0  ;;  %v756_v46 = vmul.f32 %v1908_v42, %v665_v43 }
 0x1e3   : > { %v1405_v47 = vpop.f32.mrb[2].mxu1  ;;  %v755_v48 = vmul.f32 %v1908_v42, %v660_v45  ;;  %vm738_vm2 = vcmp.ge.f32.partialorder %v660_v45, 0.0 }
 0x1e4   : > { %v675_v49 = vadd.f32 %v1405_v47, %v1906_v41  ;;  %v669_v50 = vpop.f32.mrb[3].mxu1  ;;  %v772_v51 = vsel %vm739_vm0, %v665_v43, %v756_v46 }
 0x1e5   : > { %v670_v52 = vadd.f32 %v669_v50, %v1906_v41  ;;  %913 = vperm.xlu1 %1495, %v772_v51   ;;  %795 = vperm.xlu0 %1494, %v772_v51   ;;  %v771_v55 = vsel %vm738_vm2, %v660_v45, %v755_v48 }
 0x1e6   : > { %v758_v53 = vmul.f32 %v1908_v42, %v675_v49  ;;  %vm741_vm3 = vcmp.ge.f32.partialorder %v675_v49, 0.0 }
 0x1e7   : > { %v1408_v54 = vpop.f32.mrb[4].mxu1  ;;  %v757_v58 = vmul.f32 %v1908_v42, %v670_v52  ;;  %vm740_vm4 = vcmp.ge.f32.partialorder %v670_v52, 0.0 }
 0x1e8   : > { %v774_v56 = vsel %vm741_vm3, %v675_v49, %v758_v53  ;;  %v679_v57 = vpop.f32.mrb[5].mxu1  ;;  %v685_v61 = vadd.f32 %v1408_v54, %v1906_v41 }
 0x1e9   : > { %1497 = vset.pattern.permute.xlu1 %v1670_v32  ;;  %790 = vperm.xlu0 %1494, %v771_v55   ;;  %v773_v62 = vsel %vm740_vm4, %v670_v52, %v757_v58  ;;  %v680_v2 = vadd.f32 %v679_v57, %v1906_v41 }
 0x1ea   : > { %805 = vperm.xlu1 %1497, %v774_v56   ;;  %v760_v1 = vmul.f32 %v1908_v42, %v685_v61  ;;  %vm743_vm5 = vcmp.ge.f32.partialorder %v685_v61, 0.0 }
 0x1eb   : > { %v1411_v59 = vpop.f32.mrb[6].mxu1  ;;  %v759_v6 = vmul.f32 %v1908_v42, %v680_v2  ;;  %vm742_vm6 = vcmp.ge.f32.partialorder %v680_v2, 0.0 }
 0x1ec   : > { %v689_v60 = vpop.f32.mrb[7].mxu1  ;;  %v776_v5 = vsel %vm743_vm5, %v685_v61, %v760_v1  ;;  %v695_v7 = vadd.f32 %v1411_v59, %v1906_v41 }
 0x1ed   : > { %1496 = vset.pattern.permute.xlu0 %v1669_v39  ;;  %v775_v10 = vsel %vm742_vm6, %v680_v2, %v759_v6  ;;  %v690_v13 = vadd.f32 %v689_v60, %v1906_v41 }
 0x1ee   : > { %800 = vperm.xlu1 %1497, %v773_v62   ;;  %909 = vperm.xlu0 %1496, %v771_v55   ;;  %v762_v11 = vmul.f32 %v1908_v42, %v695_v7  ;;  %vm745_vm7 = vcmp.ge.f32.partialorder %v695_v7, 0.0 }
 0x1ef   : > { %v1414_v63 = vpop.f32.mrb[8].mxu1  ;;  %v761_v20 = vmul.f32 %v1908_v42, %v690_v13  ;;  %vm744_vm10 = vcmp.ge.f32.partialorder %v690_v13, 0.0 }
 0x1f0   : > { %v699_v0 = vpop.f32.mrb[9].mxu1  ;;  %v778_v18 = vsel %vm745_vm7, %v695_v7, %v762_v11  ;;  %v705_v22 = vadd.f32 %v1414_v63, %v1906_v41 }
 0x1f1   : > { %v777_v24 = vsel %vm744_vm10, %v690_v13, %v761_v20  ;;  %v700_v26 = vadd.f32 %v699_v0, %v1906_v41 }
 0x1f2   : > { %1498 = vset.pattern.permute.xlu1 %v1669_v39  ;;  %921 = vperm.xlu0 %1496, %v774_v56   ;;  %v764_v25 = vmul.f32 %v1908_v42, %v705_v22  ;;  %vm747_vm11 = vcmp.ge.f32.partialorder %v705_v22, 0.0 }
 0x1f3   : > { %917 = vperm.xlu1 %1498, %v773_v62   ;;  %v1417_v3 = vpop.f32.mrb[10].mxu1  ;;  %v763_v28 = vmul.f32 %v1908_v42, %v700_v26  ;;  %vm746_vm12 = vcmp.ge.f32.partialorder %v700_v26, 0.0 }
 0x1f4   : > { %v709_v4 = vpop.f32.mrb[11].mxu1  ;;  %v780_v27 = vsel %vm747_vm11, %v705_v22, %v764_v25  ;;  %v715_v33 = vadd.f32 %v1417_v3, %v1906_v41 }
 0x1f5   : > { %v779_v35 = vsel %vm746_vm12, %v700_v26, %v763_v28  ;;  %v710_v37 = vadd.f32 %v709_v4, %v1906_v41 }
 0x1f6   : > { %929 = vperm.xlu0 %1496, %v776_v5   ;;  %v766_v36 = vmul.f32 %v1908_v42, %v715_v33  ;;  %vm749_vm13 = vcmp.ge.f32.partialorder %v715_v33, 0.0 }
 0x1f7   : > { %1499 = vset.pattern.permute.xlu1 %v1670_v32  ;;  %v1420_v8 = vpop.f32.mrb[12].mxu1  ;;  %v765_v34 = vmul.f32 %v1908_v42, %v710_v37  ;;  %vm748_vm14 = vcmp.ge.f32.partialorder %v710_v37, 0.0 }
 0x1f8   : > { %815 = vperm.xlu1 %1499, %v776_v5   ;;  %v1927_v9 = vpop.f32.mrb[13].mxu1  ;;  %v782_v38 = vsel %vm749_vm13, %v715_v33, %v766_v36  ;;  %v725_v43 = vadd.f32 %v1420_v8, %v1906_v41 }
 0x1f9   : > { %v781_v44 = vsel %vm748_vm14, %v710_v37, %v765_v34  ;;  %v720_v46 = vadd.f32 %v1927_v9, %v1906_v41 }
 0x1fa   : > { %1500 = vset.pattern.permute.xlu0 %v1670_v32  ;;  %v768_v45 = vmul.f32 %v1908_v42, %v725_v43  ;;  %vm751_vm15 = vcmp.ge.f32.partialorder %v725_v43, 0.0 }
 0x1fb   : > { %810 = vperm.xlu0 %1500, %v775_v10   ;;  %v1423_v12 = vpop.f32.mrb[14].mxu1  ;;  %v767_v48 = vmul.f32 %v1908_v42, %v720_v46  ;;  %vm750_vm1 = vcmp.ge.f32.partialorder %v720_v46, 0.0 }
 0x1fc   : > { %1501 = vset.pattern.permute.xlu1 %v1669_v39  ;;  %v735_v14 = vadd.f32 %v1423_v12, %v1906_v41  ;;  %v729_v15 = vpop.f32.mrb[15].mxu1  ;;  %v784_v47 = vsel %vm751_vm15, %v725_v43, %v768_v45 }
 0x1fd   : > { %925 = vperm.xlu1 %1501, %v775_v10   ;;  %v730_v16 = vadd.f32 %v729_v15, %v1906_v41  ;;  %v783_v49 = vsel %vm750_vm1, %v720_v46, %v767_v48  ;;  %v787_v41 = vld [vmem:[%s2237_s3] sm:$0x3] }
 0x1fe   : > { %v770_v17 = vmul.f32 %v1908_v42, %v735_v14  ;;  %vm753_vm8 = vcmp.ge.f32.partialorder %v735_v14, 0.0  ;;  %v1976_v50 = vrot.slane %v787_v41, %v292_v30 }
 0x1ff   : > { %1503 = vset.pattern.permute.xlu0 %v1669_v39  ;;  %v769_v19 = vmul.f32 %v1908_v42, %v730_v16  ;;  %vm752_vm9 = vcmp.ge.f32.partialorder %v730_v16, 0.0  ;;  %v890_v42 = vsub.s32 2, %v1837_v29 }
 0x200   : > { %937 = vperm.xlu0 %1503, %v778_v18   ;;  %v786_v21 = vsel %vm753_vm8, %v735_v14, %v770_v17 }
 0x201   : > { %1502 = vset.pattern.permute.xlu1 %v1670_v32  ;;  %v785_v23 = vsel %vm752_vm9, %v730_v16, %v769_v19  ;;  %v1983_v51 = vrot.slane %v1843_v31, %v890_v42 }
 0x202   : > { %825 = vperm.xlu1 %1502, %v778_v18  }
 0x204   : > { %1504 = vset.pattern.permute.xlu0 %v1670_v32 }
 0x205   : > { %820 = vperm.xlu0 %1504, %v777_v24  }
 0x206   : > { %1505 = vset.pattern.permute.xlu1 %v1669_v39 }
 0x207   : > { %933 = vperm.xlu1 %1505, %v777_v24  }
 0x209   : > { %1507 = vset.pattern.permute.xlu0 %v1669_v39 }
 0x20a   : > { %945 = vperm.xlu0 %1507, %v780_v27  }
 0x20b   : > { %1506 = vset.pattern.permute.xlu1 %v1670_v32 }
 0x20c   : > { %835 = vperm.xlu1 %1506, %v780_v27  }
 0x20e   : > { %1508 = vset.pattern.permute.xlu0 %v1670_v32 }
 0x20f   : > { %830 = vperm.xlu0 %1508, %v779_v35  }
 0x210   : > { %1509 = vset.pattern.permute.xlu1 %v1669_v39 }
 0x211   : > { %941 = vperm.xlu1 %1509, %v779_v35  }
 0x213   : > { %1511 = vset.pattern.permute.xlu0 %v1669_v39 }
 0x214   : > { %953 = vperm.xlu0 %1511, %v782_v38  }
 0x215   : > { %1510 = vset.pattern.permute.xlu1 %v1670_v32 }
 0x216   : > { %845 = vperm.xlu1 %1510, %v782_v38  }
 0x218   : > { %1512 = vset.pattern.permute.xlu0 %v1670_v32 }
 0x219   : > { %840 = vperm.xlu0 %1512, %v781_v44  }
 0x21a   : > { %1513 = vset.pattern.permute.xlu1 %v1669_v39 }
 0x21b   : > { %949 = vperm.xlu1 %1513, %v781_v44  }
 0x21d   : > { %1515 = vset.pattern.permute.xlu0 %v1669_v39 }
 0x21e   : > { %961 = vperm.xlu0 %1515, %v784_v47  }
 0x21f   : > { %1514 = vset.pattern.permute.xlu1 %v1670_v32 }
 0x220   : > { %855 = vperm.xlu1 %1514, %v784_v47  }
 0x222   : > { %1516 = vset.pattern.permute.xlu0 %v1670_v32 }
 0x223   : > { %850 = vperm.xlu0 %1516, %v783_v49  }
 0x224   : > { %1517 = vset.pattern.permute.xlu1 %v1669_v39 }
 0x225   : > { %957 = vperm.xlu1 %1517, %v783_v49  }
 0x227   : > { %860 = vperm.xlu0 %1516, %v785_v23  }
 0x229   : > { %1518 = vset.pattern.permute.xlu1 %v1670_v32  ;;  %v1980_v32 = vrot.slane %v787_v41, %v543_v40 }
 0x22a   : > { %865 = vperm.xlu1 %1518, %v786_v21  }
 0x22b   : > { %1520 = vset.pattern.permute.xlu0 %v1669_v39 }
 0x22c   : > { %969 = vperm.xlu0 %1520, %v786_v21  }
 0x22e   : > { %1519 = vset.pattern.permute.xlu1 %v1669_v39 }
 0x22f   : > { %965 = vperm.xlu1 %1519, %v785_v23  }
 0x264   : > { %v914_v52 = vpop.permute.xlu1 %913  ;;  %v796_v39 = vpop.permute.xlu0 %795 }
 0x265   : > { %v873_v53 = vmul.f32 %v1976_v50, %v796_v39  ;;  %v977_v54 = vmul.f32 %v1980_v32, %v914_v52 }
 0x267   : > { %v893_v55 = vadd.f32 %v1983_v51, %v873_v53 }
 0x268   : > { %v791_v56 = vpop.permute.xlu0 %790 }
 0x269   : > { %v806_v57 = vpop.permute.xlu1 %805  ;;  %v1988_v58 = vadd.f32 %v977_v54, %v893_v55  ;;  %v872_v30 = vmul.f32 %v1976_v50, %v791_v56 }
 0x26a   : > { %v875_v59 = vmul.f32 %v1976_v50, %v806_v57 }
 0x26b   : > { %1010 = vmax.xlane.f32.xlu0 %v1988_v58  ;;  %v892_v31 = vadd.f32 %v1983_v51, %v872_v30 }
 0x26c   : > { %v895_v0 = vadd.f32 %v1983_v51, %v875_v59 }
 0x26d   : > { %v801_v29 = vpop.permute.xlu1 %800  ;;  %v910_v40 = vpop.permute.xlu0 %909 }
 0x26e   : > { %v976_v60 = vmul.f32 %v1980_v32, %v910_v40  ;;  %v874_v61 = vmul.f32 %v1976_v50, %v801_v29 }
 0x270   : > { %v1996_v62 = vadd.f32 %v976_v60, %v892_v31  ;;  %v894_v3 = vadd.f32 %v1983_v51, %v874_v61 }
 0x271   : > { %v922_v63 = vpop.permute.xlu0 %921 }
 0x272   : > { %v979_v1 = vmul.f32 %v1980_v32, %v922_v63  ;;  %v918_v2 = vpop.permute.xlu1 %917  ;;  %1008 = vmax.xlane.f32.xlu1 %v1996_v62 }
 0x273   : > { %v978_v4 = vmul.f32 %v1980_v32, %v918_v2 }
 0x274   : > { %v2003_v5 = vadd.f32 %v979_v1, %v895_v0 }
 0x275   : > { %v930_v6 = vpop.permute.xlu0 %929  ;;  %v2005_v7 = vadd.f32 %v978_v4, %v894_v3 }
 0x276   : > { %1014 = vmax.xlane.f32.xlu1 %v2003_v5  ;;  %v981_v10 = vmul.f32 %v1980_v32, %v930_v6 }
 0x277   : > { %v816_v8 = vpop.permute.xlu1 %815  ;;  %1012 = vmax.xlane.f32.xlu0 %v2005_v7 }
 0x278   : > { %v877_v9 = vmul.f32 %v1976_v50, %v816_v8 }
 0x27a   : > { %v897_v11 = vadd.f32 %v1983_v51, %v877_v9  ;;  %v811_v12 = vpop.permute.xlu0 %810 }
 0x27b   : > { %v876_v13 = vmul.f32 %v1976_v50, %v811_v12 }
 0x27c   : > { %v926_v14 = vpop.permute.xlu1 %925  ;;  %v2013_v15 = vadd.f32 %v981_v10, %v897_v11 }
 0x27d   : > { %v896_v16 = vadd.f32 %v1983_v51, %v876_v13  ;;  %v980_v17 = vmul.f32 %v1980_v32, %v926_v14 }
 0x27e   : > { %1018 = vmax.xlane.f32.xlu1 %v2013_v15 }
 0x27f   : > { %v938_v18 = vpop.permute.xlu0 %937  ;;  %v2018_v19 = vadd.f32 %v980_v17, %v896_v16 }
 0x280   : > { %v983_v22 = vmul.f32 %v1980_v32, %v938_v18 }
 0x281   : > { %v826_v20 = vpop.permute.xlu1 %825  ;;  %1016 = vmax.xlane.f32.xlu0 %v2018_v19 }
 0x282   : > { %v879_v21 = vmul.f32 %v1976_v50, %v826_v20 }
 0x284   : > { %v899_v23 = vadd.f32 %v1983_v51, %v879_v21  ;;  %v821_v24 = vpop.permute.xlu0 %820 }
 0x285   : > { %v878_v25 = vmul.f32 %v1976_v50, %v821_v24 }
 0x286   : > { %v934_v26 = vpop.permute.xlu1 %933  ;;  %v2025_v27 = vadd.f32 %v983_v22, %v899_v23 }
 0x287   : > { %v898_v28 = vadd.f32 %v1983_v51, %v878_v25  ;;  %v982_v33 = vmul.f32 %v1980_v32, %v934_v26 }
 0x288   : > { %1022 = vmax.xlane.f32.xlu1 %v2025_v27 }
 0x289   : > { %v946_v35 = vpop.permute.xlu0 %945  ;;  %v2030_v36 = vadd.f32 %v982_v33, %v898_v28 }
 0x28a   : > { %v985_v34 = vmul.f32 %v1980_v32, %v946_v35 }
 0x28b   : > { %v836_v37 = vpop.permute.xlu1 %835  ;;  %1020 = vmax.xlane.f32.xlu0 %v2030_v36 }
 0x28c   : > { %v881_v38 = vmul.f32 %v1976_v50, %v836_v37 }
 0x28e   : > { %v901_v43 = vadd.f32 %v1983_v51, %v881_v38  ;;  %v831_v44 = vpop.permute.xlu0 %830 }
 0x28f   : > { %v880_v45 = vmul.f32 %v1976_v50, %v831_v44 }
 0x290   : > { %v942_v46 = vpop.permute.xlu1 %941  ;;  %v2037_v47 = vadd.f32 %v985_v34, %v901_v43 }
 0x291   : > { %v900_v48 = vadd.f32 %v1983_v51, %v880_v45  ;;  %v984_v49 = vmul.f32 %v1980_v32, %v942_v46 }
 0x292   : > { %1026 = vmax.xlane.f32.xlu1 %v2037_v47 }
 0x293   : > { %v954_v41 = vpop.permute.xlu0 %953  ;;  %v2042_v42 = vadd.f32 %v984_v49, %v900_v48 }
 0x294   : > { %v987_v53 = vmul.f32 %v1980_v32, %v954_v41 }
 0x295   : > { %v846_v52 = vpop.permute.xlu1 %845  ;;  %1024 = vmax.xlane.f32.xlu0 %v2042_v42 }
 0x296   : > { %v883_v39 = vmul.f32 %v1976_v50, %v846_v52 }
 0x298   : > { %v903_v54 = vadd.f32 %v1983_v51, %v883_v39  ;;  %v841_v55 = vpop.permute.xlu0 %840 }
 0x299   : > { %v882_v56 = vmul.f32 %v1976_v50, %v841_v55 }
 0x29a   : > { %v950_v57 = vpop.permute.xlu1 %949  ;;  %v2049_v30 = vadd.f32 %v987_v53, %v903_v54 }
 0x29b   : > { %v902_v29 = vadd.f32 %v1983_v51, %v882_v56  ;;  %v986_v40 = vmul.f32 %v1980_v32, %v950_v57 }
 0x29c   : > { %1030 = vmax.xlane.f32.xlu1 %v2049_v30 }
 0x29d   : > { %v962_v31 = vpop.permute.xlu0 %961  ;;  %v2054_v59 = vadd.f32 %v986_v40, %v902_v29 }
 0x29e   : > { %v989_v63 = vmul.f32 %v1980_v32, %v962_v31 }
 0x29f   : > { %v856_v60 = vpop.permute.xlu1 %855  ;;  %1028 = vmax.xlane.f32.xlu0 %v2054_v59 }
 0x2a0   : > { %v885_v61 = vmul.f32 %v1976_v50, %v856_v60 }
 0x2a2   : > { %v905_v0 = vadd.f32 %v1983_v51, %v885_v61  ;;  %v851_v1 = vpop.permute.xlu0 %850 }
 0x2a3   : > { %v884_v2 = vmul.f32 %v1976_v50, %v851_v1 }
 0x2a4   : > { %v958_v3 = vpop.permute.xlu1 %957  ;;  %v2061_v4 = vadd.f32 %v989_v63, %v905_v0 }
 0x2a5   : > { %v904_v6 = vadd.f32 %v1983_v51, %v884_v2  ;;  %v988_v8 = vmul.f32 %v1980_v32, %v958_v3 }
 0x2a6   : > { %1034 = vmax.xlane.f32.xlu1 %v2061_v4  ;;  %v861_v9 = vpop.permute.xlu0 %860 }
 0x2a7   : > { %v2066_v10 = vadd.f32 %v988_v8, %v904_v6  ;;  %v886_v13 = vmul.f32 %v1976_v50, %v861_v9 }
 0x2a9   : > { %v866_v11 = vpop.permute.xlu1 %865  ;;  %1032 = vmax.xlane.f32.xlu0 %v2066_v10  ;;  %v906_v21 = vadd.f32 %v1983_v51, %v886_v13 }
 0x2aa   : > { %v887_v12 = vmul.f32 %v1976_v50, %v866_v11 }
 0x2ab   : > { %v970_v14 = vpop.permute.xlu0 %969 }
 0x2ac   : > { %v907_v16 = vadd.f32 %v1983_v51, %v887_v12  ;;  %v991_v17 = vmul.f32 %v1980_v32, %v970_v14 }
 0x2ae   : > { %v966_v18 = vpop.permute.xlu1 %965  ;;  %v2073_v20 = vadd.f32 %v991_v17, %v907_v16 }
 0x2af   : > { %v990_v22 = vmul.f32 %v1980_v32, %v966_v18 }
 0x2b0   : > { %1038 = vmax.xlane.f32.xlu1 %v2073_v20 }
 0x2b1   : > { %v2078_v23 = vadd.f32 %v990_v22, %v906_v21 }
 0x2b3   : > { %1036 = vmax.xlane.f32.xlu0 %v2078_v23 }
 0x2f8   : > { %v1011_v24 = vpop.xlane.xlu0 %1010 }
 0x2f9   : > { %v2082_v50 = vsub.f32 %v1988_v58, %v1011_v24 }
 0x2fb   : > { %v1058_v25 = vmul.f32 1.442695, %v2082_v50 }
 0x2fd   : > { %1521 = vpow2.f32 %v1058_v25 }
 0x2ff   : > { %v1009_v26 = vpop.xlane.xlu1 %1008 }
 0x300   : > { %v2086_v28 = vsub.f32 %v1996_v62, %v1009_v26 }
 0x302   : > { %v1056_v51 = vmul.f32 1.442695, %v2086_v28 }
 0x303   : > { %v1015_v32 = vpop.xlane.xlu1 %1014 }
 0x304   : > { %1523 = vpow2.f32 %v1056_v51  ;;  %v2090_v33 = vsub.f32 %v2003_v5, %v1015_v32  ;;  %v1013_v35 = vpop.xlane.xlu0 %1012 }
 0x305   : > { %v2093_v37 = vsub.f32 %v2005_v7, %v1013_v35 }
 0x306   : > { %v1062_v58 = vmul.f32 1.442695, %v2090_v33 }
 0x307   : > { %v1522_v38 = vpop.eup %1521  ;;  %v1060_v34 = vmul.f32 1.442695, %v2093_v37 }
 0x308   : > { %1525 = vpow2.f32 %v1062_v58  ;;  %1090 = vadd.xlane.f32.xlu1 %v1522_v38 }
 0x309   : > { %1527 = vpow2.f32 %v1060_v34 }
 0x30b   : > { %v1019_v62 = vpop.xlane.xlu1 %1018 }
 0x30c   : > { %v2098_v43 = vsub.f32 %v2013_v15, %v1019_v62 }
 0x30e   : > { %v1524_v44 = vpop.eup %1523  ;;  %v1066_v5 = vmul.f32 1.442695, %v2098_v43  ;;  %v1017_v45 = vpop.xlane.xlu0 %1016 }
 0x30f   : > { %v2102_v46 = vsub.f32 %v2018_v19, %v1017_v45  ;;  %1088 = vadd.xlane.f32.xlu0 %v1524_v44 }
 0x310   : > { %1529 = vpow2.f32 %v1066_v5 }
 0x311   : > { %v1064_v7 = vmul.f32 1.442695, %v2102_v46 }
 0x312   : > { %v1526_v48 = vpop.eup %1525 }
 0x313   : > { %v1528_v49 = vpop.eup %1527  ;;  %1531 = vpow2.f32 %v1064_v7  ;;  %1094 = vadd.xlane.f32.xlu1 %v1526_v48 }
 0x314   : > { %1092 = vadd.xlane.f32.xlu0 %v1528_v49 }
 0x315   : > { %v1023_v41 = vpop.xlane.xlu1 %1022 }
 0x316   : > { %v2106_v15 = vsub.f32 %v2025_v27, %v1023_v41 }
 0x318   : > { %v1070_v52 = vmul.f32 1.442695, %v2106_v15  ;;  %v1021_v39 = vpop.xlane.xlu0 %1020 }
 0x319   : > { %v2110_v53 = vsub.f32 %v2030_v36, %v1021_v39 }
 0x31a   : > { %v1530_v19 = vpop.eup %1529  ;;  %1533 = vpow2.f32 %v1070_v52 }
 0x31b   : > { %v1068_v54 = vmul.f32 1.442695, %v2110_v53  ;;  %1098 = vadd.xlane.f32.xlu1 %v1530_v19 }
 0x31d   : > { %v1532_v55 = vpop.eup %1531  ;;  %1535 = vpow2.f32 %v1068_v54 }
 0x31e   : > { %1096 = vadd.xlane.f32.xlu0 %v1532_v55 }
 0x31f   : > { %v1027_v56 = vpop.xlane.xlu1 %1026 }
 0x320   : > { %v2114_v57 = vsub.f32 %v2037_v47, %v1027_v56 }
 0x322   : > { %v1074_v27 = vmul.f32 1.442695, %v2114_v57  ;;  %v1025_v29 = vpop.xlane.xlu0 %1024 }
 0x323   : > { %v2118_v40 = vsub.f32 %v2042_v42, %v1025_v29 }
 0x324   : > { %v1534_v36 = vpop.eup %1533  ;;  %1537 = vpow2.f32 %v1074_v27 }
 0x325   : > { %v1072_v31 = vmul.f32 1.442695, %v2118_v40  ;;  %1102 = vadd.xlane.f32.xlu1 %v1534_v36 }
 0x327   : > { %v1536_v60 = vpop.eup %1535  ;;  %1539 = vpow2.f32 %v1072_v31 }
 0x328   : > { %1100 = vadd.xlane.f32.xlu0 %v1536_v60 }
 0x329   : > { %v1031_v61 = vpop.xlane.xlu1 %1030 }
 0x32a   : > { %v2122_v63 = vsub.f32 %v2049_v30, %v1031_v61 }
 0x32c   : > { %v1078_v47 = vmul.f32 1.442695, %v2122_v63  ;;  %v1029_v0 = vpop.xlane.xlu0 %1028 }
 0x32d   : > { %v2126_v1 = vsub.f32 %v2054_v59, %v1029_v0 }
 0x32e   : > { %v1538_v42 = vpop.eup %1537  ;;  %1541 = vpow2.f32 %v1078_v47 }
 0x32f   : > { %v1076_v2 = vmul.f32 1.442695, %v2126_v1  ;;  %1106 = vadd.xlane.f32.xlu1 %v1538_v42 }
 0x331   : > { %v1540_v3 = vpop.eup %1539  ;;  %1543 = vpow2.f32 %v1076_v2 }
 0x332   : > { %1104 = vadd.xlane.f32.xlu0 %v1540_v3 }
 0x333   : > { %v1035_v6 = vpop.xlane.xlu1 %1034 }
 0x334   : > { %v2130_v8 = vsub.f32 %v2061_v4, %v1035_v6 }
 0x336   : > { %v1082_v30 = vmul.f32 1.442695, %v2130_v8  ;;  %v1033_v9 = vpop.xlane.xlu0 %1032 }
 0x337   : > { %v2134_v11 = vsub.f32 %v2066_v10, %v1033_v9 }
 0x338   : > { %v1542_v59 = vpop.eup %1541  ;;  %1545 = vpow2.f32 %v1082_v30 }
 0x339   : > { %v1080_v12 = vmul.f32 1.442695, %v2134_v11  ;;  %1110 = vadd.xlane.f32.xlu1 %v1542_v59 }
 0x33b   : > { %v1544_v13 = vpop.eup %1543  ;;  %1547 = vpow2.f32 %v1080_v12 }
 0x33c   : > { %1108 = vadd.xlane.f32.xlu0 %v1544_v13 }
 0x33d   : > { %v1039_v14 = vpop.xlane.xlu1 %1038 }
 0x33e   : > { %v2138_v16 = vsub.f32 %v2073_v20, %v1039_v14 }
 0x340   : > { %v1086_v4 = vmul.f32 1.442695, %v2138_v16  ;;  %v1037_v17 = vpop.xlane.xlu0 %1036 }
 0x341   : > { %v2142_v18 = vsub.f32 %v2078_v23, %v1037_v17 }
 0x342   : > { %v1546_v10 = vpop.eup %1545  ;;  %1549 = vpow2.f32 %v1086_v4 }
 0x343   : > { %v1084_v21 = vmul.f32 1.442695, %v2142_v18  ;;  %1114 = vadd.xlane.f32.xlu1 %v1546_v10 }
 0x345   : > { %v1548_v22 = vpop.eup %1547  ;;  %1551 = vpow2.f32 %v1084_v21 }
 0x346   : > { %1112 = vadd.xlane.f32.xlu0 %v1548_v22 }
 0x34c   : > { %v1550_v24 = vpop.eup %1549 }
 0x34d   : > { %1118 = vadd.xlane.f32.xlu1 %v1550_v24 }
 0x34f   : > { %v1552_v20 = vpop.eup %1551 }
 0x350   : > { %1116 = vadd.xlane.f32.xlu0 %v1552_v20 }
 0x395   : > { %v1091_v25 = vpop.xlane.xlu1 %1090 }
 0x396   : > { %1553 = vlog2.f32 %v1091_v25 }
 0x39c   : > { %v1089_v26 = vpop.xlane.xlu0 %1088 }
 0x39d   : > { %1555 = vlog2.f32 %v1089_v26 }
 0x3a0   : > { %v1554_v23 = vpop.eup %1553  ;;  %v1095_v51 = vpop.xlane.xlu1 %1094 }
 0x3a1   : > { %v1123_v32 = vmul.f32 0.6931472, %v1554_v23  ;;  %1557 = vlog2.f32 %v1095_v51  ;;  %v1093_v35 = vpop.xlane.xlu0 %1092 }
 0x3a2   : > { %1559 = vlog2.f32 %v1093_v35 }
 0x3a3   : > { %v1153_v58 = vsub.f32 %v2082_v50, %v1123_v32 }
 0x3a5   : > { %1169 = vst [vmem:[%s2149_s14 + $0x8] sm:$0xff] %v1153_v58 }
 0x3a7   : > { %v1556_v38 = vpop.eup %1555 }
 0x3a8   : > { %v1121_v34 = vmul.f32 0.6931472, %v1556_v38  ;;  %v1099_v62 = vpop.xlane.xlu1 %1098 }
 0x3a9   : > { %1561 = vlog2.f32 %v1099_v62 }
 0x3aa   : > { %v1152_v44 = vsub.f32 %v2086_v28, %v1121_v34 }
 0x3ab   : > { %v1558_v5 = vpop.eup %1557  ;;  %v1097_v45 = vpop.xlane.xlu0 %1096 }
 0x3ac   : > { %v1560_v7 = vpop.eup %1559  ;;  %1168 = vst [vmem:[%s2149_s14] sm:$0xff] %v1152_v44  ;;  %v1127_v48 = vmul.f32 0.6931472, %v1558_v5  ;;  %1563 = vlog2.f32 %v1097_v45 }
 0x3ad   : > { %v1125_v50 = vmul.f32 0.6931472, %v1560_v7 }
 0x3ae   : > { %v1155_v49 = vsub.f32 %v2090_v33, %v1127_v48 }
 0x3af   : > { %v1154_v41 = vsub.f32 %v2093_v37, %v1125_v50 }
 0x3b0   : > { %1171 = vst [vmem:[%s2149_s14 + $0x18] sm:$0xff] %v1155_v49 }
 0x3b1   : > { %1170 = vst [vmem:[%s2149_s14 + $0x10] sm:$0xff] %v1154_v41 }
 0x3b2   : > { %v1103_v52 = vpop.xlane.xlu1 %1102 }
 0x3b3   : > { %v1562_v39 = vpop.eup %1561  ;;  %1565 = vlog2.f32 %v1103_v52 }
 0x3b4   : > { %v1131_v19 = vmul.f32 0.6931472, %v1562_v39 }
 0x3b5   : > { %v1101_v28 = vpop.xlane.xlu0 %1100 }
 0x3b6   : > { %v1564_v54 = vpop.eup %1563  ;;  %v1157_v55 = vsub.f32 %v2098_v43, %v1131_v19  ;;  %1567 = vlog2.f32 %v1101_v28 }
 0x3b7   : > { %v1129_v56 = vmul.f32 0.6931472, %v1564_v54 }
 0x3b8   : > { %1173 = vst [vmem:[%s2149_s14 + $0x28] sm:$0xff] %v1157_v55 }
 0x3b9   : > { %v1156_v27 = vsub.f32 %v2102_v46, %v1129_v56 }
 0x3bb   : > { %1172 = vst [vmem:[%s2149_s14 + $0x20] sm:$0xff] %v1156_v27 }
 0x3bc   : > { %v1107_v33 = vpop.xlane.xlu1 %1106 }
 0x3bd   : > { %v1566_v37 = vpop.eup %1565  ;;  %1569 = vlog2.f32 %v1107_v33 }
 0x3be   : > { %v1135_v29 = vmul.f32 0.6931472, %v1566_v37 }
 0x3bf   : > { %v1105_v36 = vpop.xlane.xlu0 %1104 }
 0x3c0   : > { %v1568_v31 = vpop.eup %1567  ;;  %v1159_v60 = vsub.f32 %v2106_v15, %v1135_v29  ;;  %1571 = vlog2.f32 %v1105_v36 }
 0x3c1   : > { %v1133_v61 = vmul.f32 0.6931472, %v1568_v31 }
 0x3c2   : > { %1175 = vst [vmem:[%s2149_s14 + $0x38] sm:$0xff] %v1159_v60 }
 0x3c3   : > { %v1158_v43 = vsub.f32 %v2110_v53, %v1133_v61 }
 0x3c5   : > { %1174 = vst [vmem:[%s2149_s14 + $0x30] sm:$0xff] %v1158_v43 }
 0x3c6   : > { %v1111_v47 = vpop.xlane.xlu1 %1110 }
 0x3c7   : > { %v1570_v0 = vpop.eup %1569  ;;  %1573 = vlog2.f32 %v1111_v47 }
 0x3c8   : > { %v1139_v46 = vmul.f32 0.6931472, %v1570_v0 }
 0x3c9   : > { %v1109_v42 = vpop.xlane.xlu0 %1108 }
 0x3ca   : > { %v1572_v2 = vpop.eup %1571  ;;  %v1161_v3 = vsub.f32 %v2114_v57, %v1139_v46  ;;  %1575 = vlog2.f32 %v1109_v42 }
 0x3cb   : > { %v1137_v6 = vmul.f32 0.6931472, %v1572_v2 }
 0x3cc   : > { %1177 = vst [vmem:[%s2149_s14 + $0x48] sm:$0xff] %v1161_v3 }
 0x3cd   : > { %v1160_v15 = vsub.f32 %v2118_v40, %v1137_v6 }
 0x3cf   : > { %1176 = vst [vmem:[%s2149_s14 + $0x40] sm:$0xff] %v1160_v15 }
 0x3d0   : > { %v1115_v30 = vpop.xlane.xlu1 %1114 }
 0x3d1   : > { %v1574_v9 = vpop.eup %1573  ;;  %1577 = vlog2.f32 %v1115_v30 }
 0x3d2   : > { %v1143_v53 = vmul.f32 0.6931472, %v1574_v9 }
 0x3d3   : > { %v1113_v59 = vpop.xlane.xlu0 %1112 }
 0x3d4   : > { %v1576_v12 = vpop.eup %1575  ;;  %v1163_v13 = vsub.f32 %v2122_v63, %v1143_v53  ;;  %1579 = vlog2.f32 %v1113_v59 }
 0x3d5   : > { %v1141_v14 = vmul.f32 0.6931472, %v1576_v12 }
 0x3d6   : > { %1179 = vst [vmem:[%s2149_s14 + $0x58] sm:$0xff] %v1163_v13 }
 0x3d7   : > { %v1162_v57 = vsub.f32 %v2126_v1, %v1141_v14 }
 0x3d9   : > { %1178 = vst [vmem:[%s2149_s14 + $0x50] sm:$0xff] %v1162_v57 }
 0x3da   : > { %v1119_v40 = vpop.xlane.xlu1 %1118 }
 0x3db   : > { %v1578_v4 = vpop.eup %1577  ;;  %1581 = vlog2.f32 %v1119_v40 }
 0x3dc   : > { %v1147_v17 = vmul.f32 0.6931472, %v1578_v4 }
 0x3dd   : > { %v1117_v10 = vpop.xlane.xlu0 %1116 }
 0x3de   : > { %v1580_v21 = vpop.eup %1579  ;;  %v1165_v22 = vsub.f32 %v2130_v8, %v1147_v17  ;;  %1583 = vlog2.f32 %v1117_v10 }
 0x3df   : > { %v1145_v63 = vmul.f32 0.6931472, %v1580_v21 }
 0x3e0   : > { %1181 = vst [vmem:[%s2149_s14 + $0x68] sm:$0xff] %v1165_v22 }
 0x3e1   : > { %v1164_v24 = vsub.f32 %v2134_v11, %v1145_v63 }
 0x3e3   : > { %1180 = vst [vmem:[%s2149_s14 + $0x60] sm:$0xff] %v1164_v24 }
 0x3e5   : > { %v1582_v1 = vpop.eup %1581 }
 0x3e6   : > { %v1151_v20 = vmul.f32 0.6931472, %v1582_v1 }
 0x3e8   : > { %v1584_v25 = vpop.eup %1583  ;;  %v1167_v26 = vsub.f32 %v2138_v16, %v1151_v20 }
 0x3e9   : > { %v1149_v23 = vmul.f32 0.6931472, %v1584_v25 }
 0x3ea   : > { %1183 = vst [vmem:[%s2149_s14 + $0x78] sm:$0xff] %v1167_v26 }
 0x3eb   : > { %v1166_v8 = vsub.f32 %v2142_v18, %v1149_v23 }
 0x3ed   : > { %1182 = vst [vmem:[%s2149_s14 + $0x70] sm:$0xff] %v1166_v8 }
 0x3ee   : > { %1613 = shalt.err (!%p1610_p2)
}
 0x3ef   : > { %s1614_s9 = scalar_lea.hbm %s2185_s19, 2048  ;;  %s1618_s12 = scalar_lea.hbm %s2240_s6, 4096 }
 0x3f0   : > { %p1615_p3 = scmp.ne.s32.totalorder %s2185_s19, %s1614_s9  ;;  %p1619_p8 = scmp.lt.u32.totalorder %s2185_s19, %s2240_s6 }
 0x3f1   : > { %p1620_p9 = scmp.lt.u32.totalorder %s1618_s12, %s1614_s9  ;;  %p1622_p11 = scmp.lt.u32.totalorder %s1614_s9, %s2185_s19 }
 0x3f2   : > { %p1616_p4 = pnand %p1615_p3, %p1747_p5 }
 0x3f3   : > { %p1621_p10 = por %p1620_p9, %p1619_p8 }
 0x3f4   : > { %p1617_p7 = pneg %p1616_p4 }
 0x3f5   : > { %p1623_p12 = por %p1622_p11, %p1621_p10 }
 0x3f7   : > { %p1624_p13 = pnand %p1623_p12, %p1617_p7 }
 0x3f9   : > { %1627 = shalt.err (!%p1624_p13)
}
 0x3fa   : > { %s1672_s15 = smov 128   ;;  %s1673_s17 = smov 8  }
 0x3fb   : > { %1444 = dma.vmem_to_hbm [thread:$0]  (%p1747_p5), %s2187_s16, 2048, %s2185_s19, %s2193_s25, %s1672_s15, %s1672_s15, %s1673_s17  }
 0x3fc PF: > { %p1456_p0 = scmp.ge.s32.totalorder %s1666_s24, 2  ;;  %s1213_s18 = sand.u32 1, %s1654_s21  }
 0x3fd   : > { %s1214_s20 = scalar_lea.sflag [#allocation3], %s1213_s18 }
 0x3fe   : > { %p1451_p1 = pnand %p1456_p0, %p1751_p6 }
 0x400   : > { %1649 = dma.done.wait (!%p1451_p1), %s1214_s20, 2048  }
 0x401   : > { %1651 = vsyncadd (!%p1451_p1), %s1214_s20, 4294965248  ;;  %p17_p2 = scmp.ge.s32.totalorder %s1734_s27, 4   ;;  %s2244_s21 = smov %s1658_s22 }
 0x402   : > { %s2245_s22 = smov %s1662_s23  ;;  %s2246_s23 = smov %s1745_s30 }
 0x403   : > { %s2247_s24 = smov %s1734_s27  ;;  %19 = sbr.rel (!%p17_p2) target bundleno = 4 (0x4), region = 84 }
 0x40a   :  { %1219 = vsyncpa [#allocation3], 1 }
 0x40b   :  { %1221 = vsyncpa [#allocation3 + $0x1], 1 }
 0x40c   :  { %1222 = vsyncpa [#allocation4], 1 }
 0x40d   :  { %1224 = vsyncpa [#allocation4 + $0x1], 1 }

</bundles_post_ra>
